<compile_context>
chip_gen: v5e
topology: v5e:2x2
jax: 0.10.0
libtpu: 0.0.40
codegen_flags: <defaults>
</compile_context>

<pallas_src>
import functools

import jax
import jax.numpy as jnp
from jax.experimental import pallas as pl
from jax.experimental.pallas import tpu as pltpu


def _round_up(n: int, m: int) -> int:
    return ((n + m - 1) // m) * m


def _vmem_capacity_bytes() -> int:
    """Physical per-core VMEM; vmem_limit_bytes must never exceed this."""
    try:
        cap = int(pltpu.get_tpu_info().vmem_capacity_bytes)
        if cap > 0:
            return cap
    except Exception:  # info query unsupported -> conservative constant only
        pass
    return 64 << 20  # conservative lower bound across v5e/v6e/v7x


def _vmem_need(tm, d_model, vpad, tn, x_item, w_item, out_item) -> int:
    return (2 * tm * d_model * x_item      # x block (double-buffered)
            + 2 * d_model * tn * w_item    # streamed weight tiles (double-buffered)
            + 2 * tn * 4                   # streamed bias tiles
            + 2 * tm * vpad * out_item     # output row slab
            + tm * vpad * 4                # f32 logits slab scratch
            + 2 * tm * 4 * 2               # running max / sum scratch
            + (1 << 20))                   # headroom


def prepare_generator_params(weight, bias, *, tn: int = 512,
                             weight_dtype=jnp.bfloat16):
    """One-time parameter preprocessing, hoisted out of the per-call path:
    transpose to (d_model, vocab), pad vocab up to a multiple of the vocab
    tile, cast the weight to the MXU dtype, and give padded columns a -1e30
    bias so they never perturb the log-softmax."""
    vocab, d_model = weight.shape
    assert bias.shape == (vocab,)
    vpad0 = _round_up(vocab, 128)
    tn = _round_up(max(128, min(int(tn), vpad0)), 128)   # 128/256-aligned tile
    vpad = _round_up(vocab, tn)
    w_p = jnp.pad(weight.T, ((0, 0), (0, vpad - vocab))).astype(weight_dtype)
    b_p = jnp.pad(bias.astype(jnp.float32), (0, vpad - vocab),
                  constant_values=-1e30).reshape(1, vpad)
    meta = dict(vocab=int(vocab), d_model=int(d_model), tn=int(tn))
    return w_p, b_p, meta


def _generator_kernel(x_ref, w_ref, b_ref, o_ref, acc_ref, m_ref, s_ref):
    # x_ref: (tm, d_model)      w_ref: (d_model, tn) bf16   b_ref: (1, tn) f32
    # o_ref: (tm, vpad)         acc_ref: (nj, tm, tn) f32   m/s_ref: (tm, 1) f32
    j = pl.program_id(1)
    nj = acc_ref.shape[0]          # static number of vocab tiles
    tn = acc_ref.shape[2]          # static vocab tile width

    @pl.when(j == 0)
    def _init():
        m_ref[...] = jnp.full_like(m_ref, -jnp.inf)
        s_ref[...] = jnp.zeros_like(s_ref)

    # MXU matmul (bf16 operands, f32 accumulation) for this vocab tile.
    x = x_ref[...].astype(jnp.bfloat16)
    z = jnp.dot(x, w_ref[...], preferred_element_type=jnp.float32) + b_ref[...]

    # Online logsumexp update — all math in f32 (EUP/XLU friendly on v5e too).
    m_prev = m_ref[...]
    m_new = jnp.maximum(m_prev, jnp.max(z, axis=-1, keepdims=True))
    s_ref[...] = s_ref[...] * jnp.exp(m_prev - m_new) + jnp.sum(
        jnp.exp(z - m_new), axis=-1, keepdims=True)
    m_ref[...] = m_new

    # Stash raw f32 logits for this vocab tile in the row slab (dynamic index
    # along the leading, untiled axis only).
    acc_ref[j] = z

    @pl.when(j == nj - 1)
    def _finalize():
        lse = m_ref[...] + jnp.log(s_ref[...])
        for jj in range(nj):  # static, 128-aligned lane slices
            o_ref[:, jj * tn:(jj + 1) * tn] = (acc_ref[jj] - lse).astype(o_ref.dtype)


def generator_apply(x, w_p, b_p, *, vocab: int, tn: int,
                    tm: int | None = None, out_dtype=None):
    """
    x:   (..., d_model)                 any float dtype
    w_p: (d_model, vpad)  bf16          from prepare_generator_params
    b_p: (1, vpad)        f32           from prepare_generator_params
    returns (..., vocab) log-probabilities in `out_dtype` (default: x.dtype;
    bf16 recommended for bandwidth-bound configs).
    """
    d_model = x.shape[-1]
    vpad = w_p.shape[1]
    assert w_p.shape[0] == d_model
    assert b_p.shape == (1, vpad)
    assert tn % 128 == 0 and vpad % tn == 0
    nj = vpad // tn

    out_dtype = jnp.dtype(out_dtype) if out_dtype is not None else x.dtype

    lead = x.shape[:-1]
    M = 1
    for s in lead:
        M *= s
    x2 = x.reshape(M, d_model)          # free (metadata only)

    x_item = x2.dtype.itemsize
    w_item = jnp.dtype(w_p.dtype).itemsize
    out_item = out_dtype.itemsize

    cap = _vmem_capacity_bytes()
    budget = (cap // 4) * 3
    if tm is None:
        tm = max(8, min(256, _round_up(M, 8)))   # 256-aligned when M is large
        while tm > 8 and _vmem_need(tm, d_model, vpad, tn,
                                    x_item, w_item, out_item) > budget:
            tm = max(8, tm // 2)
    need = _vmem_need(tm, d_model, vpad, tn, x_item, w_item, out_item)
    vmem_limit = int(min(cap, max(need + (2 << 20), 32 << 20)))

    grid_m = pl.cdiv(M, tm)
    grid = (grid_m, nj)

    cost = pl.CostEstimate(
        flops=2 * grid_m * tm * d_model * vpad,
        transcendentals=grid_m * tm * vpad + 2 * grid_m * tm * nj,
        bytes_accessed=(M * d_model * x_item            # activations
                        + grid_m * d_model * vpad * w_item   # weight re-streamed per row tile
                        + grid_m * vpad * 4              # bias
                        + M * vocab * out_item),         # output (written once)
    )

    out = pl.pallas_call(
        _generator_kernel,
        out_shape=jax.ShapeDtypeStruct((M, vocab), out_dtype),
        grid_spec=pltpu.PrefetchScalarGridSpec(
            num_scalar_prefetch=0,
            grid=grid,
            in_specs=[
                pl.BlockSpec((tm, d_model), lambda i, j: (i, 0)),   # x rows (constant over j)
                pl.BlockSpec((d_model, tn), lambda i, j: (0, j)),   # streamed weight tile
                pl.BlockSpec((1, tn), lambda i, j: (0, j)),         # streamed bias tile
            ],
            out_specs=pl.BlockSpec((tm, vpad), lambda i, j: (i, 0)),  # resident row slab
            scratch_shapes=[
                pltpu.VMEM((nj, tm, tn), jnp.float32),   # raw f32 logits slab
                pltpu.VMEM((tm, 1), jnp.float32),        # running max
                pltpu.VMEM((tm, 1), jnp.float32),        # running sum(exp)
            ],
        ),
        compiler_params=pltpu.CompilerParams(
            dimension_semantics=("parallel", "arbitrary"),
            vmem_limit_bytes=vmem_limit,
        ),
        cost_estimate=cost,
    )(x2, w_p, b_p)

    return out.reshape(*lead, vocab)


if __name__ == "__main__":
    # Small shapes consistent with the module: (batch, seq, d_model) -> (batch, seq, vocab)
    batch, seq, d_model, vocab = 2, 8, 32, 128

    key = jax.random.PRNGKey(0)
    kx, kw, kb = jax.random.split(key, 3)

    # Deterministic params mimicking nn.Linear default init (uniform +/- 1/sqrt(d_model)).
    bound = 1.0 / (d_model ** 0.5)
    weight = jax.random.uniform(kw, (vocab, d_model), jnp.float32, -bound, bound)
    bias = jax.random.uniform(kb, (vocab,), jnp.float32, -bound, bound)
    x = jax.random.normal(kx, (batch, seq, d_model), jnp.float32)

    # One-time parameter prep (hoisted out of the per-call path).
    w_p, b_p, meta = prepare_generator_params(weight, bias)

    fwd = jax.jit(functools.partial(generator_apply,
                                    vocab=meta["vocab"], tn=meta["tn"]))
    out = jax.block_until_ready(fwd(x, w_p, b_p))

    # Sanity check against a plain f32 JAX reference (loose tolerance because
    # the kernel matmul runs in bf16 with f32 accumulation).
    ref = jax.nn.log_softmax(x @ weight.T + bias, axis=-1)
    assert out.shape == (batch, seq, vocab)
    assert out.dtype == x.dtype
    assert jnp.allclose(out, ref, atol=3e-2, rtol=3e-2), float(jnp.max(jnp.abs(out - ref)))
    # Rows must be valid log-probability distributions.
    assert jnp.allclose(jnp.exp(out).sum(axis=-1), 1.0, atol=1e-3)

    print("KERNEL_OK")
</pallas_src>

<mosaic_0001>
module attributes {stable_mosaic.version = 11 : i64} {
  func.func @_generator_kernel(%arg0: i32, %arg1: i32, %arg2: memref<16x32xf32, #tpu.memory_space<vmem>>, %arg3: memref<32x128xbf16, #tpu.memory_space<vmem>>, %arg4: memref<1x128xf32, #tpu.memory_space<vmem>>, %arg5: memref<16x128xf32, #tpu.memory_space<vmem>>, %arg6: memref<1x16x128xf32, #tpu.memory_space<vmem>>, %arg7: memref<16x1xf32, #tpu.memory_space<vmem>>, %arg8: memref<16x1xf32, #tpu.memory_space<vmem>>) attributes {dimension_semantics = [#tpu.dimension_semantics<parallel>, #tpu.dimension_semantics<arbitrary>], iteration_bounds = array<i64: 1, 1>, scalar_prefetch = 0 : i64, scratch_operands = 3 : i64, tpu.core_type = #tpu.core_type<tc>, window_params = [{transform_indices = @transform_0, window_bounds = array<i64: 16, 32>}, {transform_indices = @transform_1, window_bounds = array<i64: 32, 128>}, {transform_indices = @transform_2, window_bounds = array<i64: 1, 128>}, {transform_indices = @transform_3, window_bounds = array<i64: 16, 128>}]} {
    %c0_i32 = arith.constant 0 : i32
    %0 = arith.cmpi eq, %arg1, %c0_i32 : i32
    %1 = arith.extui %0 : i1 to i32
    %c0_i32_0 = arith.constant 0 : i32
    %2 = arith.cmpi ne, %1, %c0_i32_0 : i32
    scf.if %2 {
      %cst_20 = arith.constant 0xFF800000 : f32
      %33 = vector.broadcast %cst_20 : f32 to vector<16x1xf32>
      %c0_21 = arith.constant 0 : index
      %c0_22 = arith.constant 0 : index
      %34 = vector.load %arg7[%c0_21, %c0_22] : memref<16x1xf32, #tpu.memory_space<vmem>>, vector<16x1xf32>
      tpu.vector_store %arg7[%c0_21, %c0_22], %33 {strides = array<i32>} : memref<16x1xf32, #tpu.memory_space<vmem>>, vector<16x1xf32>,
      %cst_23 = arith.constant 0.000000e+00 : f32
      %35 = vector.broadcast %cst_23 : f32 to vector<16x1xf32>
      %c0_24 = arith.constant 0 : index
      %c0_25 = arith.constant 0 : index
      %36 = vector.load %arg8[%c0_24, %c0_25] : memref<16x1xf32, #tpu.memory_space<vmem>>, vector<16x1xf32>
      tpu.vector_store %arg8[%c0_24, %c0_25], %35 {strides = array<i32>} : memref<16x1xf32, #tpu.memory_space<vmem>>, vector<16x1xf32>,
    } else {
    }
    %c0 = arith.constant 0 : index
    %c0_1 = arith.constant 0 : index
    %3 = vector.load %arg2[%c0, %c0_1] : memref<16x32xf32, #tpu.memory_space<vmem>>, vector<16x32xf32>
    %4 = arith.truncf %3 : vector<16x32xf32> to vector<16x32xbf16>
    %c0_2 = arith.constant 0 : index
    %c0_3 = arith.constant 0 : index
    %5 = vector.load %arg3[%c0_2, %c0_3] : memref<32x128xbf16, #tpu.memory_space<vmem>>, vector<32x128xbf16>
    %cst = arith.constant dense<0.000000e+00> : vector<16x128xf32>
    %6 = tpu.matmul %4, %5, %cst {dimension_numbers = #tpu.dot_dimension_numbers<[1], [0], [0], [1], [0, 0, 1, 1], [], []>} : vector<16x32xbf16>, vector<32x128xbf16>, vector<16x128xf32> -> vector<16x128xf32>
    %c0_4 = arith.constant 0 : index
    %c0_5 = arith.constant 0 : index
    %7 = vector.load %arg4[%c0_4, %c0_5] : memref<1x128xf32, #tpu.memory_space<vmem>>, vector<1x128xf32>
    %8 = vector.broadcast %7 : vector<1x128xf32> to vector<16x128xf32>
    %9 = arith.addf %6, %8 : vector<16x128xf32>
    %c0_6 = arith.constant 0 : index
    %c0_7 = arith.constant 0 : index
    %10 = vector.load %arg7[%c0_6, %c0_7] : memref<16x1xf32, #tpu.memory_space<vmem>>, vector<16x1xf32>
    %cst_8 = arith.constant dense<0xFF800000> : vector<16xf32>
    %11 = vector.multi_reduction <maximumf>, %9, %cst_8 [1] : vector<16x128xf32> to vector<16xf32>
    %12 = vector.shape_cast %11 : vector<16xf32> to vector<16x1xf32>
    %13 = arith.maximumf %10, %12 : vector<16x1xf32>
    %c0_9 = arith.constant 0 : index
    %c0_10 = arith.constant 0 : index
    %14 = vector.load %arg8[%c0_9, %c0_10] : memref<16x1xf32, #tpu.memory_space<vmem>>, vector<16x1xf32>
    %15 = arith.subf %10, %13 : vector<16x1xf32>
    %16 = math.exp %15 : vector<16x1xf32>
    %17 = arith.mulf %14, %16 : vector<16x1xf32>
    %18 = vector.broadcast %13 : vector<16x1xf32> to vector<16x128xf32>
    %19 = arith.subf %9, %18 : vector<16x128xf32>
    %20 = math.exp %19 : vector<16x128xf32>
    %cst_11 = arith.constant dense<0.000000e+00> : vector<16xf32>
    %21 = vector.multi_reduction <add>, %20, %cst_11 [1] : vector<16x128xf32> to vector<16xf32>
    %22 = vector.shape_cast %21 : vector<16xf32> to vector<16x1xf32>
    %23 = arith.addf %17, %22 : vector<16x1xf32>
    %c0_12 = arith.constant 0 : index
    %c0_13 = arith.constant 0 : index
    %24 = vector.load %arg8[%c0_12, %c0_13] : memref<16x1xf32, #tpu.memory_space<vmem>>, vector<16x1xf32>
    tpu.vector_store %arg8[%c0_12, %c0_13], %23 {strides = array<i32>} : memref<16x1xf32, #tpu.memory_space<vmem>>, vector<16x1xf32>,
    %c0_14 = arith.constant 0 : index
    %c0_15 = arith.constant 0 : index
    %25 = vector.load %arg7[%c0_14, %c0_15] : memref<16x1xf32, #tpu.memory_space<vmem>>, vector<16x1xf32>
    tpu.vector_store %arg7[%c0_14, %c0_15], %13 {strides = array<i32>} : memref<16x1xf32, #tpu.memory_space<vmem>>, vector<16x1xf32>,
    %26 = arith.index_cast %arg1 : i32 to index
    %c0_16 = arith.constant 0 : index
    %c0_17 = arith.constant 0 : index
    %27 = vector.load %arg6[%26, %c0_16, %c0_17] : memref<1x16x128xf32, #tpu.memory_space<vmem>>, vector<1x16x128xf32>
    %28 = vector.shape_cast %27 : vector<1x16x128xf32> to vector<16x128xf32>
    %29 = vector.shape_cast %9 : vector<16x128xf32> to vector<1x16x128xf32>
    tpu.vector_store %arg6[%26, %c0_16, %c0_17], %29 {strides = array<i32>} : memref<1x16x128xf32, #tpu.memory_space<vmem>>, vector<1x16x128xf32>,
    %c0_i32_18 = arith.constant 0 : i32
    %30 = arith.cmpi eq, %arg1, %c0_i32_18 : i32
    %31 = arith.extui %30 : i1 to i32
    %c0_i32_19 = arith.constant 0 : i32
    %32 = arith.cmpi ne, %31, %c0_i32_19 : i32
    scf.if %32 {
      %c0_20 = arith.constant 0 : index
      %c0_21 = arith.constant 0 : index
      %33 = vector.load %arg7[%c0_20, %c0_21] : memref<16x1xf32, #tpu.memory_space<vmem>>, vector<16x1xf32>
      %c0_22 = arith.constant 0 : index
      %c0_23 = arith.constant 0 : index
      %34 = vector.load %arg8[%c0_22, %c0_23] : memref<16x1xf32, #tpu.memory_space<vmem>>, vector<16x1xf32>
      %35 = math.log %34 : vector<16x1xf32>
      %36 = arith.addf %33, %35 : vector<16x1xf32>
      %c0_24 = arith.constant 0 : index
      %c0_25 = arith.constant 0 : index
      %c0_26 = arith.constant 0 : index
      %37 = vector.load %arg6[%c0_24, %c0_25, %c0_26] : memref<1x16x128xf32, #tpu.memory_space<vmem>>, vector<1x16x128xf32>
      %38 = vector.shape_cast %37 : vector<1x16x128xf32> to vector<16x128xf32>
      %39 = vector.broadcast %36 : vector<16x1xf32> to vector<16x128xf32>
      %40 = arith.subf %38, %39 : vector<16x128xf32>
      %c0_27 = arith.constant 0 : index
      %c0_28 = arith.constant 0 : index
      %41 = vector.load %arg5[%c0_27, %c0_28] : memref<16x128xf32, #tpu.memory_space<vmem>>, vector<16x128xf32>
      tpu.vector_store %arg5[%c0_27, %c0_28], %40 {strides = array<i32>} : memref<16x128xf32, #tpu.memory_space<vmem>>, vector<16x128xf32>,
    } else {
    }
    return
  }
  func.func @transform_0(%arg0: i32, %arg1: i32) -> (i32, i32) {
    %c0_i32 = arith.constant 0 : i32
    %c0_i32_0 = arith.constant 0 : i32
    return %arg0, %c0_i32 : i32, i32
  }
  func.func @transform_1(%arg0: i32, %arg1: i32) -> (i32, i32) {
    %c0_i32 = arith.constant 0 : i32
    %c0_i32_0 = arith.constant 0 : i32
    return %c0_i32, %arg1 : i32, i32
  }
  func.func @transform_2(%arg0: i32, %arg1: i32) -> (i32, i32) {
    %c0_i32 = arith.constant 0 : i32
    %c0_i32_0 = arith.constant 0 : i32
    return %c0_i32, %arg1 : i32, i32
  }
  func.func @transform_3(%arg0: i32, %arg1: i32) -> (i32, i32) {
    %c0_i32 = arith.constant 0 : i32
    %c0_i32_0 = arith.constant 0 : i32
    return %arg0, %c0_i32 : i32, i32
  }
}

</mosaic_0001>

<bundles_post_ra>
// kernel: generator_apply.1
= control target key start
LH: loop header
LB: loop body
LE: loop exit
PB: predicated region body
PF: predicated region fallthrough
CT: control target
= control target key end

     0   :  { %8 = vsyncpa [#allocation6], 0  ;;  %s376_s0 = inlined_call_operand.hbm [shape: f32[16,32], index: 0, kind: input, shape index: {}]   ;;  %s377_s1 = inlined_call_operand.hbm [shape: bf16[32,128], index: 1, kind: input, shape index: {}]   ;;  %s378_s2 = inlined_call_operand.vmem [shape: f32[1,128], index: 2, kind: input, shape index: {}]   ;;  %s379_s3 = inlined_call_operand.hbm [shape: f32[16,128], index: 3, kind: output, shape index: {}]  }
   0x1   :  { %9 = vsyncpa [#allocation9], 0 }
   0x2   :  { %10 = vsyncpa [#allocation7], 0  ;;  %s15_s14 = sshll.u32 %s376_s0, 4  ;;  %s310_s15 = smov [#allocation5]   ;;  %s16_s14 = int_to_ptr.hbm [resolvable:$true] %s15_s14 }
   0x3   :  { %s17_s16 = sshll.u32 %s310_s15, 4  ;;  %s28_s19 = sshll.u32 %s377_s1, 4  ;;  %s18_s16 = int_to_ptr.vmem [resolvable:$true] %s17_s16  ;;  %s29_s19 = int_to_ptr.hbm [resolvable:$true] %s28_s19 }
   0x4   :  { %s311_s20 = smov 128   ;;  %s312_s21 = smov 8  }
   0x5   :  { %23 = dma.hbm_to_vmem [thread:$0]  %s16_s14, 256, %s18_s16, [#allocation6], %s311_s20, %s311_s20, %s312_s21  }
   0x6   :  { %s313_s22 = smov [#allocation8]   ;;  %s314_s24 = smov 64  }
   0x7   :  { %s30_s23 = sshll.u32 %s313_s22, 4  ;;  %s315_s0 = smov 4   ;;  %s31_s23 = int_to_ptr.vmem [resolvable:$true] %s30_s23 }
   0x8   :  { %36 = dma.hbm_to_vmem [thread:$0]  %s29_s19, 256, %s31_s23, [#allocation9], %s314_s24, %s314_s24, %s315_s0  }
   0x9   :  { %304 = dma.done.wait [#allocation6], 256  }
   0xa   :  { %305 = vsyncadd [#allocation6], 4294967040 }
   0xb   :  { %306 = dma.done.wait [#allocation9], 256  }
   0xc   :  { %307 = vsyncadd [#allocation9], 4294967040  ;;  %v206_v0 = vld [vmem:[#allocation8 + $0x8] sm:$0xff]  ;;  %v205_v1 = vld [vmem:[#allocation8] sm:$0xff]  ;;  %vm80_vm0 = vcmask 261120   ;;  %vm52_vm1 = vcmask 7168  }
   0xd   :  { %90 = vmatpush.bf16.msra.mxu0 %v206_v0  ;;  %v57_v2 = vld [vmem:[#allocation5] sm:$0xff]  ;;  %v58_v3 = vld [vmem:[#allocation5 + $0x8] sm:$0xff]  ;;  %v316_v5 = vmov -inf   ;;  %v317_v11 = vmov 0   ;;  %v318_v12 = vmov 0.0   ;;  %s182_s29 = sshll.u32 %s379_s3, 4  ;;  %s183_s29 = int_to_ptr.hbm [resolvable:$true] %s182_s29 }
   0xe   :  { %v59_v4 = vpack.c.bf16 %v58_v3, %v57_v2  ;;  %53 = vst.msk [vmem:[#allocation3] sm:$0xff] %vm52_vm1, %v316_v5  ;;  %v219_v6 = vld [vmem:[%s378_s2] ss:$0 sm:$0xff]  ;;  %217 = vset.pattern.permute.xlu1 %v317_v11  ;;  %218 = vset.pattern.permute.xlu0 %v317_v11  ;;  %s319_s2 = smov [#allocation10]  }
   0xf   :  { %54 = vst.msk [vmem:[#allocation3 + $0x8] sm:$0xff] %vm52_vm1, %v316_v5  ;;  %s180_s26 = sshll.u32 %s319_s2, 4  ;;  %s181_s26 = int_to_ptr.vmem [resolvable:$true] %s180_s26 }
  0x10   :  { %55 = vst.msk [vmem:[#allocation4] sm:$0xff] %vm52_vm1, %v318_v12 }
  0x11   :  { %91 = vmatpush.bf16.msra.mxu0 %v205_v1  ;;  %56 = vst.msk [vmem:[#allocation4 + $0x8] sm:$0xff] %vm52_vm1, %v318_v12 }
  0x14   :  { %204 = vmatmul.msk.bf16.vlgmr.msra.gmra.mxu0 %vm80_vm0, %v59_v4 }
  0x15   :  { %v98_v13 = vld [vmem:[#allocation3] sm:$0xff] }
  0x16   :  { %v99_v17 = vld [vmem:[#allocation3 + $0x8] sm:$0xff] }
  0x17   :  { %v106_v32 = vld [vmem:[#allocation4] sm:$0xff] }
  0x18   :  { %v107_v37 = vld [vmem:[#allocation4 + $0x8] sm:$0xff] }
  0x91   :  { %v93_v7 = vpop.f32.mrf.mxu0 }
  0x92   :  { %v354_v8 = vadd.f32 %v219_v6, %v93_v7 }
  0x94   :  { %100 = vmax.xlane.f32.xlu0 %v354_v8 }
  0x99   :  { %v95_v9 = vpop.f32.mrf.mxu0 }
  0x9a   :  { %v357_v10 = vadd.f32 %v219_v6, %v95_v9 }
  0x9c   :  { %102 = vmax.xlane.f32.xlu0 %v357_v10 }
 0x107   :  { %v101_v14 = vpop.xlane.xlu0 %100 }
 0x108   :  { %v104_v15 = vmax.f32 %v98_v13, %v101_v14 }
 0x10a   :  { %v108_v16 = vsub.f32 %v98_v13, %v104_v15  ;;  %141 = vst.msk [vmem:[#allocation3] sm:$0xff] %vm52_vm1, %v104_v15  ;;  %118 = vperm.xlu1 %217, %v104_v15  }
 0x10c   :  { %v110_v29 = vmul.f32 1.442695, %v108_v16 }
 0x10f   :  { %v103_v18 = vpop.xlane.xlu0 %102 }
 0x110   :  { %v105_v19 = vmax.f32 %v99_v17, %v103_v18 }
 0x111   :  { %v150_v45 = vld [vmem:[#allocation3] sm:$0xff] }
 0x112   :  { %v109_v20 = vsub.f32 %v99_v17, %v105_v19  ;;  %142 = vst.msk [vmem:[#allocation3 + $0x8] sm:$0xff] %vm52_vm1, %v105_v19  ;;  %123 = vperm.xlu1 %217, %v105_v19  }
 0x114   :  { %v112_v30 = vmul.f32 1.442695, %v109_v20 }
 0x119   :  { %v151_v49 = vld [vmem:[#allocation3 + $0x8] sm:$0xff] }
 0x17c   :  { %v119_v21 = vpop.permute.xlu1 %118 }
 0x17d   :  { %v126_v22 = vsub.f32 %v354_v8, %v119_v21 }
 0x17f   :  { %v128_v23 = vmul.f32 1.442695, %v126_v22 }
 0x181   :  { %220 = vpow2.f32 %v128_v23 }
 0x184   :  { %v124_v24 = vpop.permute.xlu1 %123 }
 0x185   :  { %v127_v25 = vsub.f32 %v357_v10, %v124_v24 }
 0x187   :  { %v221_v26 = vpop.eup %220  ;;  %v130_v27 = vmul.f32 1.442695, %v127_v25 }
 0x188   :  { %132 = vadd.xlane.f32.xlu2 %v221_v26 }
 0x189   :  { %222 = vpow2.f32 %v130_v27 }
 0x18a   :  { %224 = vpow2.f32 %v110_v29 }
 0x18b   :  { %226 = vpow2.f32 %v112_v30 }
 0x18f   :  { %v223_v28 = vpop.eup %222 }
 0x190   :  { %134 = vadd.xlane.f32.xlu2 %v223_v28  ;;  %v225_v31 = vpop.eup %224 }
 0x191   :  { %v114_v33 = vmul.f32 %v225_v31, %v106_v32  ;;  %v227_v36 = vpop.eup %226 }
 0x192   :  { %v115_v38 = vmul.f32 %v227_v36, %v107_v37 }
 0x1fb   :  { %v133_v34 = vpop.xlane.xlu2 %132 }
 0x1fc   :  { %v136_v35 = vadd.f32 %v133_v34, %v114_v33 }
 0x1fe   :  { %139 = vst.msk [vmem:[#allocation4] sm:$0xff] %vm52_vm1, %v136_v35 }
 0x203   :  { %v135_v39 = vpop.xlane.xlu2 %134 }
 0x204   :  { %v137_v40 = vadd.f32 %v135_v39, %v115_v38 }
 0x205   :  { %v152_v41 = vld [vmem:[#allocation4] sm:$0xff] }
 0x206   :  { %140 = vst.msk [vmem:[#allocation4 + $0x8] sm:$0xff] %vm52_vm1, %v137_v40  ;;  %228 = vlog2.f32 %v152_v41 }
 0x20c   :  { %v229_v42 = vpop.eup %228 }
 0x20d   :  { %v155_v43 = vmul.f32 0.6931472, %v229_v42  ;;  %v153_v44 = vld [vmem:[#allocation4 + $0x8] sm:$0xff] }
 0x20e   :  { %230 = vlog2.f32 %v153_v44 }
 0x20f   :  { %v158_v46 = vadd.f32 %v155_v43, %v150_v45 }
 0x211   :  { %164 = vperm.xlu0 %218, %v158_v46  }
 0x214   :  { %v231_v47 = vpop.eup %230 }
 0x215   :  { %v157_v48 = vmul.f32 0.6931472, %v231_v47 }
 0x217   :  { %v159_v50 = vadd.f32 %v157_v48, %v151_v49 }
 0x219   :  { %169 = vperm.xlu1 %217, %v159_v50  }
 0x283   :  { %v165_v51 = vpop.permute.xlu0 %164 }
 0x284   :  { %v172_v52 = vsub.f32 %v354_v8, %v165_v51 }
 0x286   :  { %174 = vst [vmem:[#allocation10] sm:$0xff] %v172_v52 }
 0x28b   :  { %v170_v53 = vpop.permute.xlu1 %169 }
 0x28c   :  { %v173_v54 = vsub.f32 %v357_v10, %v170_v53 }
 0x28e   :  { %175 = vst [vmem:[#allocation10 + $0x8] sm:$0xff] %v173_v54 }
 0x28f   :  { %188 = dma.vmem_to_hbm [thread:$0]  %s181_s26, 256, %s183_s29, [#allocation7], %s311_s20, %s311_s20, %s312_s21  }
 0x290   :  { %308 = dma.done.wait [#allocation7], 256  }
 0x291   :  { %309 = vsyncadd [#allocation7], 4294967040 }
 0x292   :  { %193 = vsyncpa [#allocation6], 1 }
 0x293   :  { %194 = vsyncpa [#allocation9], 1 }
 0x294   :  { %195 = vsyncpa [#allocation7], 1 }

</bundles_post_ra>
